<compile_context>
chip_gen: v7x
topology: tpu7x:2x2x1
jax: 0.10.0
libtpu: 0.0.40
codegen_flags: <defaults>
</compile_context>

<pallas_src>
import functools

import jax
import jax.numpy as jnp
from jax import lax
from jax.experimental import pallas as pl
from jax.experimental.pallas import tpu as pltpu


_VMEM_LIMIT_BYTES = 48 * 1024 * 1024   # explicit scoped-VMEM budget (headroom under v7x's 64 MiB)
_NEG_BIG = -1e30                       # finite "-inf": avoids NaN rows if a tile were fully masked


def _pick_tile(total, cap):
    """Largest multiple-of-8 divisor of `total` that is <= cap, else `total` (full dim)."""
    if total <= cap:
        return total
    for t in range(cap, 7, -8):
        if total % t == 0:
            return t
    return total


def _qkv_proj_kernel(x_ref, wqkv_ref, q_ref, k_ref, v_ref, *, n_heads, head_size):
    """x block (1, tm, C) f32; wqkv (C, 3C) bf16 -> q/k/v blocks (1, H, tm, hs) bf16."""
    x = x_ref[0].astype(jnp.bfloat16)                                   # (tm, C)
    c = n_heads * head_size
    # Single fused QKV GEMM: one MXU pass, lane-dense 3C output.
    qkv = jnp.dot(x, wqkv_ref[...], preferred_element_type=jnp.float32)  # (tm, 3C) f32
    # Scatter into head-major layout (done once here so the attention kernel never lane-slices).
    for h in range(n_heads):
        lo = h * head_size
        hi = lo + head_size
        q_ref[0, h] = qkv[:, lo:hi].astype(jnp.bfloat16)
        k_ref[0, h] = qkv[:, c + lo:c + hi].astype(jnp.bfloat16)
        v_ref[0, h] = qkv[:, 2 * c + lo:2 * c + hi].astype(jnp.bfloat16)


def _attn_kernel(q_ref, k_ref, v_ref, wp_ref, bp_ref, o_ref,
                 m_scr, l_scr, acc_scr, *, n_heads, head_size, scale):
    """Flash-style causal attention + fused per-head output projection.

    Grid: (B, nq, nk); kv axis (last) is the online-softmax reduction axis.
    q_ref: (1, H, tq, hs) bf16; k_ref/v_ref: (1, H, tk, hs) bf16
    wp_ref: (H, hs, C) bf16; bp_ref: (1, C) f32; o_ref: (1, tq, C)
    scratch: m/l (H, tq, 1) f32, acc (H, tq, hs) f32
    """
    qi = pl.program_id(1)
    ki = pl.program_id(2)
    nk = pl.num_programs(2)
    tq = q_ref.shape[2]
    tk = k_ref.shape[2]
    c_out = o_ref.shape[-1]

    @pl.when(ki == 0)
    def _init():
        m_scr[...] = jnp.full_like(m_scr, -jnp.inf)
        l_scr[...] = jnp.zeros_like(l_scr)
        acc_scr[...] = jnp.zeros_like(acc_scr)

    # Causal tile skipping: tiles strictly above the diagonal contribute nothing (tq == tk).
    @pl.when(ki <= qi)
    def _update():
        rows = qi * tq + lax.broadcasted_iota(jnp.int32, (tq, tk), 0)
        cols = ki * tk + lax.broadcasted_iota(jnp.int32, (tq, tk), 1)
        causal = cols <= rows
        for h in range(n_heads):
            q_h = q_ref[0, h]                                           # (tq, hs) bf16
            k_h = k_ref[0, h]                                           # (tk, hs) bf16
            v_h = v_ref[0, h]                                           # (tk, hs) bf16
            # scores: contract over head dim, no explicit transpose
            s = lax.dot_general(q_h, k_h, (((1,), (1,)), ((), ())),
                                preferred_element_type=jnp.float32) * scale
            s = jnp.where(causal, s, jnp.float32(_NEG_BIG))
            m_prev = m_scr[h]                                           # (tq, 1)
            m_new = jnp.maximum(m_prev, jnp.max(s, axis=-1, keepdims=True))
            alpha = jnp.exp(m_prev - m_new)
            p = jnp.exp(s - m_new)
            l_scr[h] = alpha * l_scr[h] + jnp.sum(p, axis=-1, keepdims=True)
            acc_scr[h] = alpha * acc_scr[h] + jnp.dot(
                p.astype(jnp.bfloat16), v_h, preferred_element_type=jnp.float32)
            m_scr[h] = m_new

    @pl.when(ki == nk - 1)
    def _finalize():
        # Per-head normalize and accumulate straight into the output projection
        # (no concat of heads, no (T, C) attention temporary).
        out = jnp.zeros((tq, c_out), jnp.float32)
        for h in range(n_heads):
            inv_l = pl.reciprocal(l_scr[h], approx=True)                # EUP vrcp, effectively free
            head = (acc_scr[h] * inv_l).astype(jnp.bfloat16)            # (tq, hs)
            out = out + jnp.dot(head, wp_ref[h], preferred_element_type=jnp.float32)
        o_ref[0] = (out + bp_ref[...]).astype(o_ref.dtype)


def multi_attention_head(x, wq, wk, wv, w_proj, b_proj, *, n_heads, seq_tile=None):
    """x: (B, T, C) f32.  wq/wk/wv: (C, C) laid out so q = x @ wq (columns head-major).
    w_proj: (C, C) = torch proj.weight.T (y = out @ w_proj + b).  b_proj: (1, C) f32."""
    B, T, C = x.shape
    head_size = C // n_heads
    assert n_heads * head_size == C, "n_embed must be divisible by n_heads"

    # Host-side weight packing: fused QKV matrix and head-major projection rows (bf16 for the MXU).
    wqkv = jnp.concatenate([wq, wk, wv], axis=1).astype(jnp.bfloat16)      # (C, 3C)
    wp_hm = w_proj.reshape(n_heads, head_size, C).astype(jnp.bfloat16)     # (H, hs, C)
    bp = b_proj.astype(jnp.float32)                                        # (1, C)

    # ---------------- kernel 1: fused QKV projection (head-major output) ----------------
    tm = _pick_tile(T, 256)
    nt = T // tm
    qkv_out = jax.ShapeDtypeStruct((B, n_heads, T, head_size), jnp.bfloat16)
    q, k, v = pl.pallas_call(
        functools.partial(_qkv_proj_kernel, n_heads=n_heads, head_size=head_size),
        out_shape=[qkv_out, qkv_out, qkv_out],
        grid_spec=pltpu.PrefetchScalarGridSpec(
            num_scalar_prefetch=0,
            grid=(B, nt),
            in_specs=[
                pl.BlockSpec((1, tm, C), lambda b, i: (b, i, 0)),
                pl.BlockSpec((C, 3 * C), lambda b, i: (0, 0)),
            ],
            out_specs=[
                pl.BlockSpec((1, n_heads, tm, head_size), lambda b, i: (b, 0, i, 0)),
                pl.BlockSpec((1, n_heads, tm, head_size), lambda b, i: (b, 0, i, 0)),
                pl.BlockSpec((1, n_heads, tm, head_size), lambda b, i: (b, 0, i, 0)),
            ],
        ),
        compiler_params=pltpu.CompilerParams(
            dimension_semantics=("parallel", "parallel"),
            vmem_limit_bytes=_VMEM_LIMIT_BYTES),
        cost_estimate=pl.CostEstimate(
            flops=2 * B * T * C * 3 * C,
            transcendentals=0,
            bytes_accessed=B * T * C * 4 + 3 * C * C * 2 + 3 * B * T * C * 2),
    )(x, wqkv)

    # ------------- kernel 2: flash attention + fused output projection -------------
    if seq_tile is None:
        tq = _pick_tile(T, 128)
    else:
        assert T % seq_tile == 0
        tq = seq_tile
    tk = tq                      # equal tiles -> only the diagonal tile is partially masked
    nq = T // tq
    nk = T // tk
    out = pl.pallas_call(
        functools.partial(_attn_kernel, n_heads=n_heads, head_size=head_size,
                          scale=float(C) ** -0.5),
        out_shape=jax.ShapeDtypeStruct((B, T, C), x.dtype),
        grid_spec=pltpu.PrefetchScalarGridSpec(
            num_scalar_prefetch=0,
            grid=(B, nq, nk),
            in_specs=[
                pl.BlockSpec((1, n_heads, tq, head_size), lambda b, i, j: (b, 0, i, 0)),
                pl.BlockSpec((1, n_heads, tk, head_size), lambda b, i, j: (b, 0, j, 0)),
                pl.BlockSpec((1, n_heads, tk, head_size), lambda b, i, j: (b, 0, j, 0)),
                pl.BlockSpec((n_heads, head_size, C), lambda b, i, j: (0, 0, 0)),
                pl.BlockSpec((1, C), lambda b, i, j: (0, 0)),
            ],
            out_specs=pl.BlockSpec((1, tq, C), lambda b, i, j: (b, i, 0)),
            scratch_shapes=[
                pltpu.VMEM((n_heads, tq, 1), jnp.float32),          # running max m
                pltpu.VMEM((n_heads, tq, 1), jnp.float32),          # running denom l
                pltpu.VMEM((n_heads, tq, head_size), jnp.float32),  # running PV acc
            ],
        ),
        compiler_params=pltpu.CompilerParams(
            dimension_semantics=("parallel", "parallel", "arbitrary"),
            vmem_limit_bytes=_VMEM_LIMIT_BYTES),
        cost_estimate=pl.CostEstimate(
            flops=4 * B * n_heads * T * T * head_size + 2 * B * T * C * C,
            transcendentals=B * n_heads * T * T,
            bytes_accessed=3 * B * T * C * 2 + n_heads * head_size * C * 2
                           + C * 4 + B * T * C * 4),
    )(q, k, v, wp_hm, bp)
    return out


def reference_mha(x, wq, wk, wv, w_proj, b_proj, *, n_heads):
    """Pure-JAX f32 reference mirroring the PyTorch forward."""
    B, T, C = x.shape
    hs = C // n_heads
    scale = C ** -0.5
    causal = jnp.tril(jnp.ones((T, T), dtype=bool))
    outs = []
    for h in range(n_heads):
        sl = slice(h * hs, (h + 1) * hs)
        q = x @ wq[:, sl]
        k = x @ wk[:, sl]
        v = x @ wv[:, sl]
        wei = (q @ jnp.swapaxes(k, -2, -1)) * scale
        wei = jnp.where(causal[None], wei, -jnp.inf)
        wei = jax.nn.softmax(wei, axis=-1)
        outs.append(wei @ v)
    out = jnp.concatenate(outs, axis=-1)
    return out @ w_proj + b_proj[0]


def _run_case(key, B, T, n_embed, n_heads, seq_tile=None):
    kx, kq, kk, kv, kp, kb = jax.random.split(key, 6)
    x = jax.random.normal(kx, (B, T, n_embed), dtype=jnp.float32)
    wq = jax.random.normal(kq, (n_embed, n_embed), dtype=jnp.float32) * 0.1
    wk = jax.random.normal(kk, (n_embed, n_embed), dtype=jnp.float32) * 0.1
    wv = jax.random.normal(kv, (n_embed, n_embed), dtype=jnp.float32) * 0.1
    w_proj = jax.random.normal(kp, (n_embed, n_embed), dtype=jnp.float32) * 0.1
    b_proj = jax.random.normal(kb, (1, n_embed), dtype=jnp.float32) * 0.1

    out = multi_attention_head(x, wq, wk, wv, w_proj, b_proj,
                               n_heads=n_heads, seq_tile=seq_tile)
    out = jax.block_until_ready(out)
    ref = reference_mha(x, wq, wk, wv, w_proj, b_proj, n_heads=n_heads)
    assert out.shape == (B, T, n_embed)
    # bf16 MXU operands -> loosened tolerance vs the f32 reference (expected precision loss).
    assert jnp.allclose(out, ref, atol=3e-2, rtol=3e-2), \
        f"mismatch vs reference (max abs err {jnp.max(jnp.abs(out - ref))})"


if __name__ == "__main__":
    key = jax.random.PRNGKey(0)
    k1, k2 = jax.random.split(key)

    # Case 1: module-sized toy config (single tile).
    _run_case(k1, B=2, T=8, n_embed=32, n_heads=4)

    # Case 2: exercises the multi-tile online-softmax path with causal tile skipping.
    _run_case(k2, B=2, T=32, n_embed=32, n_heads=4, seq_tile=16)

    print("KERNEL_OK")
</pallas_src>

<mosaic_0001>
module attributes {stable_mosaic.version = 11 : i64} {
  func.func @_qkv_proj_kernel(%arg0: i32, %arg1: i32, %arg2: memref<1x8x32xf32, #tpu.memory_space<vmem>>, %arg3: memref<32x96xbf16, #tpu.memory_space<vmem>>, %arg4: memref<1x4x8x8xbf16, #tpu.memory_space<vmem>>, %arg5: memref<1x4x8x8xbf16, #tpu.memory_space<vmem>>, %arg6: memref<1x4x8x8xbf16, #tpu.memory_space<vmem>>) attributes {dimension_semantics = [#tpu.dimension_semantics<parallel>, #tpu.dimension_semantics<parallel>], iteration_bounds = array<i64: 2, 1>, scalar_prefetch = 0 : i64, scratch_operands = 0 : i64, tpu.core_type = #tpu.core_type<tc>, window_params = [{transform_indices = @transform_0, window_bounds = array<i64: 1, 8, 32>}, {pipeline_mode = #tpu.pipeline_mode<synchronous>, transform_indices = @transform_1, window_bounds = array<i64: 32, 96>}, {transform_indices = @transform_2, window_bounds = array<i64: 1, 4, 8, 8>}, {transform_indices = @transform_3, window_bounds = array<i64: 1, 4, 8, 8>}, {transform_indices = @transform_4, window_bounds = array<i64: 1, 4, 8, 8>}]} {
    %c0 = arith.constant 0 : index
    %c0_0 = arith.constant 0 : index
    %c0_1 = arith.constant 0 : index
    %0 = vector.load %arg2[%c0, %c0_0, %c0_1] : memref<1x8x32xf32, #tpu.memory_space<vmem>>, vector<1x8x32xf32>
    %1 = vector.shape_cast %0 : vector<1x8x32xf32> to vector<8x32xf32>
    %2 = arith.truncf %1 : vector<8x32xf32> to vector<8x32xbf16>
    %c0_2 = arith.constant 0 : index
    %c0_3 = arith.constant 0 : index
    %3 = vector.load %arg3[%c0_2, %c0_3] : memref<32x96xbf16, #tpu.memory_space<vmem>>, vector<32x96xbf16>
    %cst = arith.constant dense<0.000000e+00> : vector<8x96xf32>
    %4 = tpu.matmul %2, %3, %cst {dimension_numbers = #tpu.dot_dimension_numbers<[1], [0], [0], [1], [0, 0, 1, 1], [], []>} : vector<8x32xbf16>, vector<32x96xbf16>, vector<8x96xf32> -> vector<8x96xf32>
    %5 = vector.extract_strided_slice %4 {offsets = [0, 0], sizes = [8, 8], strides = [1, 1]} : vector<8x96xf32> to vector<8x8xf32>
    %6 = arith.truncf %5 : vector<8x8xf32> to vector<8x8xbf16>
    %c0_4 = arith.constant 0 : index
    %c0_5 = arith.constant 0 : index
    %c0_6 = arith.constant 0 : index
    %c0_7 = arith.constant 0 : index
    %7 = vector.load %arg4[%c0_4, %c0_5, %c0_6, %c0_7] : memref<1x4x8x8xbf16, #tpu.memory_space<vmem>>, vector<1x1x8x8xbf16>
    %8 = vector.shape_cast %7 : vector<1x1x8x8xbf16> to vector<8x8xbf16>
    %9 = vector.shape_cast %6 : vector<8x8xbf16> to vector<1x1x8x8xbf16>
    tpu.vector_store %arg4[%c0_4, %c0_5, %c0_6, %c0_7], %9 {strides = array<i32>} : memref<1x4x8x8xbf16, #tpu.memory_space<vmem>>, vector<1x1x8x8xbf16>,
    %10 = vector.extract_strided_slice %4 {offsets = [0, 32], sizes = [8, 8], strides = [1, 1]} : vector<8x96xf32> to vector<8x8xf32>
    %11 = arith.truncf %10 : vector<8x8xf32> to vector<8x8xbf16>
    %c0_8 = arith.constant 0 : index
    %c0_9 = arith.constant 0 : index
    %c0_10 = arith.constant 0 : index
    %c0_11 = arith.constant 0 : index
    %12 = vector.load %arg5[%c0_8, %c0_9, %c0_10, %c0_11] : memref<1x4x8x8xbf16, #tpu.memory_space<vmem>>, vector<1x1x8x8xbf16>
    %13 = vector.shape_cast %12 : vector<1x1x8x8xbf16> to vector<8x8xbf16>
    %14 = vector.shape_cast %11 : vector<8x8xbf16> to vector<1x1x8x8xbf16>
    tpu.vector_store %arg5[%c0_8, %c0_9, %c0_10, %c0_11], %14 {strides = array<i32>} : memref<1x4x8x8xbf16, #tpu.memory_space<vmem>>, vector<1x1x8x8xbf16>,
    %15 = vector.extract_strided_slice %4 {offsets = [0, 64], sizes = [8, 8], strides = [1, 1]} : vector<8x96xf32> to vector<8x8xf32>
    %16 = arith.truncf %15 : vector<8x8xf32> to vector<8x8xbf16>
    %c0_12 = arith.constant 0 : index
    %c0_13 = arith.constant 0 : index
    %c0_14 = arith.constant 0 : index
    %c0_15 = arith.constant 0 : index
    %17 = vector.load %arg6[%c0_12, %c0_13, %c0_14, %c0_15] : memref<1x4x8x8xbf16, #tpu.memory_space<vmem>>, vector<1x1x8x8xbf16>
    %18 = vector.shape_cast %17 : vector<1x1x8x8xbf16> to vector<8x8xbf16>
    %19 = vector.shape_cast %16 : vector<8x8xbf16> to vector<1x1x8x8xbf16>
    tpu.vector_store %arg6[%c0_12, %c0_13, %c0_14, %c0_15], %19 {strides = array<i32>} : memref<1x4x8x8xbf16, #tpu.memory_space<vmem>>, vector<1x1x8x8xbf16>,
    %20 = vector.extract_strided_slice %4 {offsets = [0, 8], sizes = [8, 8], strides = [1, 1]} : vector<8x96xf32> to vector<8x8xf32>
    %21 = arith.truncf %20 : vector<8x8xf32> to vector<8x8xbf16>
    %c0_16 = arith.constant 0 : index
    %c1 = arith.constant 1 : index
    %c0_17 = arith.constant 0 : index
    %c0_18 = arith.constant 0 : index
    %22 = vector.load %arg4[%c0_16, %c1, %c0_17, %c0_18] : memref<1x4x8x8xbf16, #tpu.memory_space<vmem>>, vector<1x1x8x8xbf16>
    %23 = vector.shape_cast %22 : vector<1x1x8x8xbf16> to vector<8x8xbf16>
    %24 = vector.shape_cast %21 : vector<8x8xbf16> to vector<1x1x8x8xbf16>
    tpu.vector_store %arg4[%c0_16, %c1, %c0_17, %c0_18], %24 {strides = array<i32>} : memref<1x4x8x8xbf16, #tpu.memory_space<vmem>>, vector<1x1x8x8xbf16>,
    %25 = vector.extract_strided_slice %4 {offsets = [0, 40], sizes = [8, 8], strides = [1, 1]} : vector<8x96xf32> to vector<8x8xf32>
    %26 = arith.truncf %25 : vector<8x8xf32> to vector<8x8xbf16>
    %c0_19 = arith.constant 0 : index
    %c1_20 = arith.constant 1 : index
    %c0_21 = arith.constant 0 : index
    %c0_22 = arith.constant 0 : index
    %27 = vector.load %arg5[%c0_19, %c1_20, %c0_21, %c0_22] : memref<1x4x8x8xbf16, #tpu.memory_space<vmem>>, vector<1x1x8x8xbf16>
    %28 = vector.shape_cast %27 : vector<1x1x8x8xbf16> to vector<8x8xbf16>
    %29 = vector.shape_cast %26 : vector<8x8xbf16> to vector<1x1x8x8xbf16>
    tpu.vector_store %arg5[%c0_19, %c1_20, %c0_21, %c0_22], %29 {strides = array<i32>} : memref<1x4x8x8xbf16, #tpu.memory_space<vmem>>, vector<1x1x8x8xbf16>,
    %30 = vector.extract_strided_slice %4 {offsets = [0, 72], sizes = [8, 8], strides = [1, 1]} : vector<8x96xf32> to vector<8x8xf32>
    %31 = arith.truncf %30 : vector<8x8xf32> to vector<8x8xbf16>
    %c0_23 = arith.constant 0 : index
    %c1_24 = arith.constant 1 : index
    %c0_25 = arith.constant 0 : index
    %c0_26 = arith.constant 0 : index
    %32 = vector.load %arg6[%c0_23, %c1_24, %c0_25, %c0_26] : memref<1x4x8x8xbf16, #tpu.memory_space<vmem>>, vector<1x1x8x8xbf16>
    %33 = vector.shape_cast %32 : vector<1x1x8x8xbf16> to vector<8x8xbf16>
    %34 = vector.shape_cast %31 : vector<8x8xbf16> to vector<1x1x8x8xbf16>
    tpu.vector_store %arg6[%c0_23, %c1_24, %c0_25, %c0_26], %34 {strides = array<i32>} : memref<1x4x8x8xbf16, #tpu.memory_space<vmem>>, vector<1x1x8x8xbf16>,
    %35 = vector.extract_strided_slice %4 {offsets = [0, 16], sizes = [8, 8], strides = [1, 1]} : vector<8x96xf32> to vector<8x8xf32>
    %36 = arith.truncf %35 : vector<8x8xf32> to vector<8x8xbf16>
    %c0_27 = arith.constant 0 : index
    %c2 = arith.constant 2 : index
    %c0_28 = arith.constant 0 : index
    %c0_29 = arith.constant 0 : index
    %37 = vector.load %arg4[%c0_27, %c2, %c0_28, %c0_29] : memref<1x4x8x8xbf16, #tpu.memory_space<vmem>>, vector<1x1x8x8xbf16>
    %38 = vector.shape_cast %37 : vector<1x1x8x8xbf16> to vector<8x8xbf16>
    %39 = vector.shape_cast %36 : vector<8x8xbf16> to vector<1x1x8x8xbf16>
    tpu.vector_store %arg4[%c0_27, %c2, %c0_28, %c0_29], %39 {strides = array<i32>} : memref<1x4x8x8xbf16, #tpu.memory_space<vmem>>, vector<1x1x8x8xbf16>,
    %40 = vector.extract_strided_slice %4 {offsets = [0, 48], sizes = [8, 8], strides = [1, 1]} : vector<8x96xf32> to vector<8x8xf32>
    %41 = arith.truncf %40 : vector<8x8xf32> to vector<8x8xbf16>
    %c0_30 = arith.constant 0 : index
    %c2_31 = arith.constant 2 : index
    %c0_32 = arith.constant 0 : index
    %c0_33 = arith.constant 0 : index
    %42 = vector.load %arg5[%c0_30, %c2_31, %c0_32, %c0_33] : memref<1x4x8x8xbf16, #tpu.memory_space<vmem>>, vector<1x1x8x8xbf16>
    %43 = vector.shape_cast %42 : vector<1x1x8x8xbf16> to vector<8x8xbf16>
    %44 = vector.shape_cast %41 : vector<8x8xbf16> to vector<1x1x8x8xbf16>
    tpu.vector_store %arg5[%c0_30, %c2_31, %c0_32, %c0_33], %44 {strides = array<i32>} : memref<1x4x8x8xbf16, #tpu.memory_space<vmem>>, vector<1x1x8x8xbf16>,
    %45 = vector.extract_strided_slice %4 {offsets = [0, 80], sizes = [8, 8], strides = [1, 1]} : vector<8x96xf32> to vector<8x8xf32>
    %46 = arith.truncf %45 : vector<8x8xf32> to vector<8x8xbf16>
    %c0_34 = arith.constant 0 : index
    %c2_35 = arith.constant 2 : index
    %c0_36 = arith.constant 0 : index
    %c0_37 = arith.constant 0 : index
    %47 = vector.load %arg6[%c0_34, %c2_35, %c0_36, %c0_37] : memref<1x4x8x8xbf16, #tpu.memory_space<vmem>>, vector<1x1x8x8xbf16>
    %48 = vector.shape_cast %47 : vector<1x1x8x8xbf16> to vector<8x8xbf16>
    %49 = vector.shape_cast %46 : vector<8x8xbf16> to vector<1x1x8x8xbf16>
    tpu.vector_store %arg6[%c0_34, %c2_35, %c0_36, %c0_37], %49 {strides = array<i32>} : memref<1x4x8x8xbf16, #tpu.memory_space<vmem>>, vector<1x1x8x8xbf16>,
    %50 = vector.extract_strided_slice %4 {offsets = [0, 24], sizes = [8, 8], strides = [1, 1]} : vector<8x96xf32> to vector<8x8xf32>
    %51 = arith.truncf %50 : vector<8x8xf32> to vector<8x8xbf16>
    %c0_38 = arith.constant 0 : index
    %c3 = arith.constant 3 : index
    %c0_39 = arith.constant 0 : index
    %c0_40 = arith.constant 0 : index
    %52 = vector.load %arg4[%c0_38, %c3, %c0_39, %c0_40] : memref<1x4x8x8xbf16, #tpu.memory_space<vmem>>, vector<1x1x8x8xbf16>
    %53 = vector.shape_cast %52 : vector<1x1x8x8xbf16> to vector<8x8xbf16>
    %54 = vector.shape_cast %51 : vector<8x8xbf16> to vector<1x1x8x8xbf16>
    tpu.vector_store %arg4[%c0_38, %c3, %c0_39, %c0_40], %54 {strides = array<i32>} : memref<1x4x8x8xbf16, #tpu.memory_space<vmem>>, vector<1x1x8x8xbf16>,
    %55 = vector.extract_strided_slice %4 {offsets = [0, 56], sizes = [8, 8], strides = [1, 1]} : vector<8x96xf32> to vector<8x8xf32>
    %56 = arith.truncf %55 : vector<8x8xf32> to vector<8x8xbf16>
    %c0_41 = arith.constant 0 : index
    %c3_42 = arith.constant 3 : index
    %c0_43 = arith.constant 0 : index
    %c0_44 = arith.constant 0 : index
    %57 = vector.load %arg5[%c0_41, %c3_42, %c0_43, %c0_44] : memref<1x4x8x8xbf16, #tpu.memory_space<vmem>>, vector<1x1x8x8xbf16>
    %58 = vector.shape_cast %57 : vector<1x1x8x8xbf16> to vector<8x8xbf16>
    %59 = vector.shape_cast %56 : vector<8x8xbf16> to vector<1x1x8x8xbf16>
    tpu.vector_store %arg5[%c0_41, %c3_42, %c0_43, %c0_44], %59 {strides = array<i32>} : memref<1x4x8x8xbf16, #tpu.memory_space<vmem>>, vector<1x1x8x8xbf16>,
    %60 = vector.extract_strided_slice %4 {offsets = [0, 88], sizes = [8, 8], strides = [1, 1]} : vector<8x96xf32> to vector<8x8xf32>
    %61 = arith.truncf %60 : vector<8x8xf32> to vector<8x8xbf16>
    %c0_45 = arith.constant 0 : index
    %c3_46 = arith.constant 3 : index
    %c0_47 = arith.constant 0 : index
    %c0_48 = arith.constant 0 : index
    %62 = vector.load %arg6[%c0_45, %c3_46, %c0_47, %c0_48] : memref<1x4x8x8xbf16, #tpu.memory_space<vmem>>, vector<1x1x8x8xbf16>
    %63 = vector.shape_cast %62 : vector<1x1x8x8xbf16> to vector<8x8xbf16>
    %64 = vector.shape_cast %61 : vector<8x8xbf16> to vector<1x1x8x8xbf16>
    tpu.vector_store %arg6[%c0_45, %c3_46, %c0_47, %c0_48], %64 {strides = array<i32>} : memref<1x4x8x8xbf16, #tpu.memory_space<vmem>>, vector<1x1x8x8xbf16>,
    return
  }
  func.func @transform_0(%arg0: i32, %arg1: i32) -> (i32, i32, i32) {
    %c0_i32 = arith.constant 0 : i32
    %c0_i32_0 = arith.constant 0 : i32
    return %arg0, %arg1, %c0_i32 : i32, i32, i32
  }
  func.func @transform_1(%arg0: i32, %arg1: i32) -> (i32, i32) {
    %c0_i32 = arith.constant 0 : i32
    %c0_i32_0 = arith.constant 0 : i32
    %c0_i32_1 = arith.constant 0 : i32
    return %c0_i32, %c0_i32_0 : i32, i32
  }
  func.func @transform_2(%arg0: i32, %arg1: i32) -> (i32, i32, i32, i32) {
    %c0_i32 = arith.constant 0 : i32
    %c0_i32_0 = arith.constant 0 : i32
    %c0_i32_1 = arith.constant 0 : i32
    return %arg0, %c0_i32, %arg1, %c0_i32_0 : i32, i32, i32, i32
  }
  func.func @transform_3(%arg0: i32, %arg1: i32) -> (i32, i32, i32, i32) {
    %c0_i32 = arith.constant 0 : i32
    %c0_i32_0 = arith.constant 0 : i32
    %c0_i32_1 = arith.constant 0 : i32
    return %arg0, %c0_i32, %arg1, %c0_i32_0 : i32, i32, i32, i32
  }
  func.func @transform_4(%arg0: i32, %arg1: i32) -> (i32, i32, i32, i32) {
    %c0_i32 = arith.constant 0 : i32
    %c0_i32_0 = arith.constant 0 : i32
    %c0_i32_1 = arith.constant 0 : i32
    return %arg0, %c0_i32, %arg1, %c0_i32_0 : i32, i32, i32, i32
  }
}

</mosaic_0001>

<bundles_post_ra>
// kernel: tpu_custom_call.1
= control target key start
LH: loop header
LB: loop body
LE: loop exit
PB: predicated region body
PF: predicated region fallthrough
CT: control target
= control target key end

     0   :  { %10 = vsyncpa [#allocation3], 0  ;;  %s1338_s0 = inlined_call_operand.hbm [shape: f32[2,8,32], index: 0, kind: input, shape index: {}]   ;;  %s1339_s1 = inlined_call_operand.hbm [shape: bf16[32,96], index: 1, kind: input, shape index: {}]   ;;  %s1340_s2 = inlined_call_operand.hbm [shape: bf16[2,4,8,8], index: 2, kind: output, shape index: {0}]   ;;  %s1341_s3 = inlined_call_operand.hbm [shape: bf16[2,4,8,8], index: 3, kind: output, shape index: {1}]   ;;  %s1342_s4 = inlined_call_operand.hbm [shape: bf16[2,4,8,8], index: 4, kind: output, shape index: {2}]  }
   0x1   :  { %12 = vsyncpa [#allocation3 + $0x1], 0 }
   0x2   :  { %13 = vsyncpa [#allocation6], 0 }
   0x3   :  { %14 = vsyncpa [#allocation4], 0 }
   0x4   :  { %16 = vsyncpa [#allocation4 + $0x1], 0 }
   0x5   :  { %17 = vsyncpa [#allocation9], 0 }
   0x6   :  { %19 = vsyncpa [#allocation9 + $0x1], 0  ;;  %s1012_s15 = smov 0   ;;  %s1014_s16 = smov 0  }
   0x7   :  { %s1016_s17 = smov 0   ;;  %s1018_s18 = smov 0  }
   0x8   :  { %s1020_s19 = smov 0   ;;  %s1022_s20 = smov 0  }
   0x9 LB: > { %s1043_s21 = sadd.s32 4294967295, %s964_s20   ;;  %s1346_s22 = sadd.s32 4294967294, %s964_s20   ;;  %s964_s20 = sphi %s1022_s20, %s25_s20   ;;  %s960_s19 = sphi %s1020_s19, %s1367_s19   ;;  %s956_s18 = sphi %s1018_s18, %s1366_s18   ;;  %s952_s17 = sphi %s1016_s17, %s1365_s17   ;;  %s948_s16 = sphi %s1014_s16, %s1364_s16   ;;  %s944_s15 = sphi %s1012_s15, %s1363_s15  }
   0xa   : > { %p59_p0 = scmp.ne.s32.totalorder %s948_s16, %s944_s15  ;;  %p1343_p1 = scmp.eq.s32.totalorder %s1043_s21, 0 }
   0xb   : > { %p112_p3 = scmp.eq.s32.totalorder %s1346_s22, 1  ;;  %p609_p5 = scmp.ge.s32.totalorder %s964_s20, 1 }
   0xc   : > { %p1054_p4 = por %p1343_p1, %p59_p0  ;;  %p175_p7 = scmp.lt.s32.totalorder %s964_s20, 3 }
   0xd   : > { %p1059_p6 = por %p112_p3, %p59_p0  ;;  %s966_s26 = smov [#allocation5]  }
   0xe   : > { %s1347_s23 = scalar_select %p1054_p4, 1, 0 }
   0xf   : > { %s1348_s24 = scalar_select %p1059_p6, 1, 0 }
  0x10   : > { %p1064_p8 = pnand %p609_p5, %p175_p7  ;;  %s187_s27 = sshll.u32 %s966_s26, 4  ;;  %s188_s27 = int_to_ptr.vmem [resolvable:$true] %s187_s27 }
  0x11   : > { %s37_s29 = sadd.s32 1, %s960_s19  ;;  %s760_s6 = scalar_lea.hbm %s1339_s1, 256 }
  0x12   : > { %s1349_s25 = scalar_select %p1064_p8, 1, 0 }
  0x13   : > { %p671_p9 = pneg %p1064_p8  ;;  %p761_p12 = scmp.ne.s32.totalorder %s1339_s1, %s760_s6 }
  0x14   : > { %p767_p5 = scmp.lt.u32.totalorder %s760_s6, %s1339_s1 }
  0x15   : > { %p1073_p11 = pnand %p671_p9, %p1343_p1 }
  0x17   : > { %p762_p13 = pneg %p1073_p11 }
  0x19   : > { %p763_p0 = pnand %p762_p13, %p761_p12 }
  0x1b   : > { %p764_p3 = pneg %p763_p0 }
  0x1d   : > { %p769_p7 = pnand %p767_p5, %p764_p3 }
  0x1f   : > { %772 = shalt.err (!%p769_p7)
}
  0x20   : > { %s773_s11 = scalar_lea.vmem %s188_s27, 256  ;;  %p781_p2 = scmp.lt.s32.totalorder %s188_s27, %s188_s27 }
  0x21   : > { %p774_p9 = scmp.ne.s32.totalorder %s188_s27, %s773_s11  ;;  %p782_p6 = scmp.lt.s32.totalorder %s773_s11, %s773_s11 }
  0x23   : > { %p776_p10 = pnand %p774_p9, %p762_p13  ;;  %p783_p4 = por %p782_p6, %p781_p2 }
  0x25   : > { %p777_p1 = pneg %p776_p10 }
  0x27   : > { %p784_p8 = pnand %p783_p4, %p777_p1 }
  0x29   : > { %787 = shalt.err (!%p784_p8)
}
  0x2a   : > { %s967_s12 = smov 64   ;;  %s968_s13 = smov 4  }
  0x2b   : > { %674 = dma.hbm_to_vmem [thread:$0]  (!%p1073_p11), %s1339_s1, 256, %s188_s27, [#allocation6], %s967_s12, %s967_s12, %s968_s13  }
  0x2c   : > { %p39_p1 = scmp.ge.s32.totalorder %s37_s29, 2  ;;  %s46_s30 = sadd.s32 1, %s952_s17 }
  0x2d   : > { %p53_p2 = scmp.ne.s32.totalorder %s952_s17, %s948_s16  ;;  %p54_p4 = scmp.eq.s32.totalorder %s964_s20, 0 }
  0x2e   : > { %s1369_s29 = smov (%p39_p1, %s37_s29), 0  ;;  %p1352_p8 = scmp.eq.s32.totalorder %s1043_s21, 1 }
  0x2f   : > { %p1100_p6 = por %p54_p4, %p53_p2  ;;  %s41_s28 = ssub.s32 %s960_s19, %s1369_s29 }
  0x30   : > { %p1106_p10 = por %p1352_p8, %p53_p2  ;;  %p690_p12 = scmp.lt.s32.totalorder %s964_s20, 2 }
  0x31   : > { %p44_p11 = scmp.eq.s32.totalorder %s41_s28, 0  ;;  %s201_s27 = sand.u32 1, %s952_s17  }
  0x32   : > { %s612_s7 = sshll.u32 %s201_s27, 3  ;;  %s613_s9 = sshll.u32 %s960_s19, 7 }
  0x33   : > { %s1115_s8 = scalar_select %p44_p11, %s952_s17, %s46_s30  }
  0x34   : > { %s1121_s12 = scalar_lea.hbm %s1338_s0, %s613_s9  ;;  %s205_s13 = scalar_lea.vmem [#allocation2], %s612_s7 }
  0x35   : > { %s213_s14 = sshll.u32 %s205_s13, 4  ;;  %p1127_p13 = pnand %p690_p12, %p1100_p6  ;;  %s1123_s14 = int_to_ptr.vmem [resolvable:$true] %s213_s14 }
  0x36   : > { %s202_s30 = scalar_lea.sflag [#allocation3], %s201_s27  ;;  %s788_s28 = scalar_lea.hbm %s1121_s12, 128 }
  0x37   : > { %p789_p0 = scmp.ne.s32.totalorder %s1121_s12, %s788_s28  ;;  %p790_p3 = pneg %p1127_p13 }
  0x38   : > { %s793_s10 = scalar_lea.hbm %s1338_s0, 256  ;;  %p794_p9 = scmp.lt.u32.totalorder %s1121_s12, %s1338_s0 }
  0x39   : > { %p791_p5 = pnand %p790_p3, %p789_p0  ;;  %p795_p1 = scmp.lt.u32.totalorder %s793_s10, %s788_s28 }
  0x3a   : > { %p797_p4 = scmp.lt.u32.totalorder %s788_s28, %s1121_s12 }
  0x3b   : > { %p792_p7 = pneg %p791_p5  ;;  %p796_p2 = por %p795_p1, %p794_p9 }
  0x3d   : > { %p798_p6 = por %p797_p4, %p796_p2 }
  0x3f   : > { %p799_p8 = pnand %p798_p6, %p792_p7 }
  0x41   : > { %802 = shalt.err (!%p799_p8)
}
  0x42   : > { %s803_s27 = scalar_lea.vmem %s1123_s14, 128  ;;  %s969_s13 = smov [#allocation2]  }
  0x43   : > { %p804_p12 = scmp.ne.s32.totalorder %s1123_s14, %s803_s27  ;;  %s808_s7 = sshll.u32 %s969_s13, 4  ;;  %s809_s7 = int_to_ptr.vmem [resolvable:$false] %s808_s7 }
  0x44   : > { %s810_s9 = scalar_lea.vmem %s809_s7, 256  ;;  %p811_p5 = scmp.lt.s32.totalorder %s1123_s14, %s809_s7 }
  0x45   : > { %p806_p11 = pnand %p804_p12, %p790_p3  ;;  %p812_p9 = scmp.lt.s32.totalorder %s810_s9, %s803_s27 }
  0x47   : > { %p807_p0 = pneg %p806_p11  ;;  %p813_p1 = por %p812_p9, %p811_p5 }
  0x49   : > { %p814_p2 = pnand %p813_p1, %p807_p0 }
  0x4b   : > { %817 = shalt.err (!%p814_p2)
}
  0x4c   : > { %678 = dma.hbm_to_vmem [thread:$0]  (!%p1127_p13), %s1121_s12, 128, %s1123_s14, %s202_s30  }
  0x4d   : > { %p1355_p7 = scmp.ne.s32.totalorder %s1349_s25, 0 }
  0x4e   : > { %s1159_s28 = sand.u32 (!%p1355_p7), 1, %s948_s16   ;;  %p1356_p3 = scmp.ne.s32.totalorder (!%p1355_p7), %s1347_s23, 0 }
  0x4f   : > { %222 = sbr.rel (%p1355_p7) target bundleno = 494 (0x1ee), region = 28  ;;  %s615_s10 = sshll.u32 (!%p1355_p7), %s1159_s28, 3 }
  0x50   : > { %s225_s5 = scalar_lea.sflag (!%p1355_p7), [#allocation3], %s1159_s28  ;;  %s228_s11 = scalar_lea.vmem (!%p1355_p7), [#allocation2], %s615_s10 }
  0x56   : > { %927 = dma.done.wait (%p1356_p3), %s225_s5, 128  }
  0x57   : > { %929 = vsyncadd (%p1356_p3), %s225_s5, 4294967168  ;;  %p1357_p4 = scmp.eq.s32.totalorder %s1043_s21, 0 }
  0x59   : > { %931 = dma.done.wait (%p1357_p4), [#allocation6], 256   ;;  %p1358_p13 = pmov %p1357_p4 }
  0x5a   : > { %v970_v0 = vmov 0.0   ;;  %vm971_vm0 = vmmov 0   ;;  %v758_v1 = vld [vmem:[#allocation5] sm:$0xff]   ;;  %v759_v2 = vld [vmem:[#allocation5 + $0x8] sm:$0xff]   ;;  %v268_v3 = vld [vmem:[%s228_s11] sm:$0xff]  ;;  %vm286_vm1 = vcmask 261120  }
  0x5b   : > { %933 = vsyncadd (%p1358_p13), [#allocation6], 4294967040  ;;  %651 = vmatprep.subr.bf16.mxu0 %v970_v0  ;;  %655 = vmatprep.mubr.msk.bf16.mxu0 %vm971_vm0, %v970_v0  ;;  %v269_v4 = vpack.c.bf16 %v268_v3, %v268_v3  ;;  %s1172_s23 = sshll.u32 %s1159_s28, 4  ;;  %vm331_vm2 = vcmask 60416   ;;  %s972_s25 = smov 80  }
  0x5c   : > { %652 = vmatpush3.bf16.msra.mxu0 %v758_v1  ;;  %s973_s12 = smov 96   ;;  %s1175_s14 = scalar_lea.vmem [#allocation7], %s1172_s23 }
  0x5d   : > { %653 = vmatprep.subr.bf16.mxu0 %v970_v0  ;;  %s974_s26 = smov 72   ;;  %s975_s30 = smov 88  }
  0x5e   : > { %s976_s27 = smov 120   ;;  %s977_s13 = smov 64  }
  0x5f   : > { %s978_s7 = smov 112   ;;  %s979_s9 = smov 56  }
  0x60   : > { %654 = vmatpush3.bf16.msra.mxu0 %v759_v2  ;;  %s980_s10 = smov 104   ;;  %s981_s5 = smov 48  }
  0x61   : > { %s982_s11 = smov 40  }
  0x63   : > { %656 = vmatmul.mubr.msk.bf16.vlgmr.msra.gmra.mrb[0].mxu0 %vm286_vm1, %v269_v4 }
 0x136   : > { %v324_v5 = vpop.f32.mrb[0].mxu0 }
 0x137   : > { %v330_v6 = vpack.c.bf16 %v324_v5, %v324_v5  ;;  %v657_v7 = vpop.f32.mrb[1].mxu0 }
 0x138   : > { %v327_v8 = vpop.f32.mrb[2].mxu0 }
 0x139   : > { %364 = vrot.lane.b32.xlu1 %v330_v6, %s972_s25  ;;  %336 = vrot.lane.b32.xlu0 %v330_v6, %s973_s12  ;;  %v658_v9 = vpop.f32.mrb[3].mxu0  ;;  %332 = vst.msk [vmem:[%s1175_s14] sm:$0xf] %vm331_vm2, %v330_v6  ;;  %s259_s25 = scalar_lea.vmem [#allocation8], %s1172_s23 }
 0x13a   : > { %s431_s12 = sshll.u32 %s259_s25, 4  ;;  %s1187_s12 = int_to_ptr.vmem [resolvable:$true] %s431_s12 }
 0x13d   : > { %379 = vrot.lane.b32.xlu1 %v330_v6, %s974_s26  ;;  %349 = vrot.lane.b32.xlu0 %v330_v6, %s975_s30  ;;  %s394_s26 = sand.u32 1, %s1043_s21   ;;  %s1183_s30 = sshll.u32 %s956_s18, 8 }
 0x13e   : > { %s1197_s18 = scalar_lea.sflag [#allocation9], %s394_s26  ;;  %s818_s21 = scalar_lea.vmem %s1187_s12, 256 }
 0x13f   : > { %p819_p6 = scmp.ne.s32.totalorder %s1187_s12, %s818_s21 }
 0x141   : > { %344 = vrot.lane.b32.xlu1 %v330_v6, %s976_s27  ;;  %340 = vrot.lane.b32.xlu0 %v330_v6, %s977_s13  ;;  %p820_p8 = pnand %p819_p6, %p1106_p10 }
 0x143   : > { %p821_p12 = pneg %p820_p8 }
 0x145   : > { %359 = vrot.lane.b32.xlu1 %v330_v6, %s978_s7  ;;  %354 = vrot.lane.b32.xlu0 %v330_v6, %s979_s9  ;;  %s1193_s9 = scalar_lea.hbm %s1341_s3, %s1183_s30 }
 0x149   : > { %374 = vrot.lane.b32.xlu1 %v330_v6, %s980_s10  ;;  %369 = vrot.lane.b32.xlu0 %v330_v6, %s981_s5  ;;  %s983_s10 = smov [#allocation8]  }
 0x14a   : > { %s822_s5 = sshll.u32 %s983_s10, 4  ;;  %s823_s5 = int_to_ptr.vmem [resolvable:$false] %s822_s5 }
 0x14b   : > { %p825_p11 = scmp.lt.s32.totalorder %s1187_s12, %s823_s5 }
 0x14d   : > { %384 = vrot.lane.b32.xlu0 %v330_v6, %s982_s11  ;;  %s824_s11 = scalar_lea.vmem %s823_s5, 512 }
 0x14e   : > { %p826_p0 = scmp.lt.s32.totalorder %s824_s11, %s818_s21 }
 0x150   : > { %p827_p5 = por %p826_p0, %p825_p11 }
 0x152   : > { %p828_p9 = pnand %p827_p5, %p821_p12 }
 0x1ab   : > { %v365_v10 = vpop.permute.xlu1 %364  ;;  %v337_v11 = vpop.permute.xlu0 %336 }
 0x1ac   : > { %628 = vst.msk [vmem:[%s259_s25 + $0x8] sm:$0xf] %vm331_vm2, %v365_v10  ;;  %339 = vst.msk [vmem:[%s259_s25] sm:$0xf] %vm331_vm2, %v337_v11 }
 0x1af   : > { %v380_v12 = vpop.permute.xlu1 %379  ;;  %v350_v13 = vpop.permute.xlu0 %349 }
 0x1b0   : > { %631 = vst.msk [vmem:[%s259_s25 + $0xc] sm:$0xf] %vm331_vm2, %v380_v12  ;;  %625 = vst.msk [vmem:[%s259_s25 + $0x4] sm:$0xf] %vm331_vm2, %v350_v13 }
 0x1b1   : > { %831 = shalt.err (!%p828_p9)
}
 0x1b2   : > { %s832_s25 = scalar_lea.hbm %s1193_s9, 256  ;;  %s836_s7 = scalar_lea.hbm %s1341_s3, 512 }
 0x1b3   : > { %p833_p1 = scmp.ne.s32.totalorder %s1193_s9, %s832_s25  ;;  %p837_p3 = scmp.lt.u32.totalorder %s1193_s9, %s1341_s3 }
 0x1b4   : > { %p838_p4 = scmp.lt.u32.totalorder %s836_s7, %s832_s25  ;;  %p840_p6 = scmp.lt.u32.totalorder %s832_s25, %s1193_s9 }
 0x1b5   : > { %p834_p2 = pnand %p833_p1, %p1106_p10 }
 0x1b6   : > { %p839_p13 = por %p838_p4, %p837_p3 }
 0x1b7   : > { %p835_p7 = pneg %p834_p2 }
 0x1b8   : > { %p841_p8 = por %p840_p6, %p839_p13 }
 0x1ba   : > { %p842_p12 = pnand %p841_p8, %p835_p7 }
 0x1bc   : > { %845 = shalt.err (!%p842_p12)
}
 0x1bd   : > { %s984_s21 = smov 4   ;;  %v345_v14 = vpop.permute.xlu1 %344  ;;  %v341_v15 = vpop.permute.xlu0 %340  ;;  %s1227_s11 = scalar_lea.vmem [#allocation10], %s1172_s23 }
 0x1be   : > { %666 = dma.vmem_to_hbm [thread:$0]  (%p1106_p10), %s1187_s12, 256, %s1193_s9, %s1197_s18, %s977_s13, %s977_s13, %s984_s21  }
 0x1bf   : > { %624 = vst.msk [vmem:[%s1175_s14 + $0x4] sm:$0xf] %vm331_vm2, %v345_v14  ;;  %343 = vst.msk [vmem:[%s1227_s11] sm:$0xf] %vm331_vm2, %v341_v15  ;;  %s414_s25 = sshll.u32 %s1175_s14, 4  ;;  %s1242_s23 = scalar_lea.hbm %s1340_s2, %s1183_s30  ;;  %s1236_s25 = int_to_ptr.vmem [resolvable:$true] %s414_s25 }
 0x1c0   : > { %s390_s27 = scalar_lea.sflag [#allocation4], %s1159_s28  ;;  %s846_s7 = scalar_lea.vmem %s1236_s25, 256 }
 0x1c1   : > { %v360_v16 = vpop.permute.xlu1 %359  ;;  %v355_v17 = vpop.permute.xlu0 %354  ;;  %p847_p11 = scmp.ne.s32.totalorder %s1236_s25, %s846_s7  ;;  %s985_s10 = smov [#allocation7]  }
 0x1c2   : > { %627 = vst.msk [vmem:[%s1175_s14 + $0x8] sm:$0xf] %vm331_vm2, %v360_v16  ;;  %626 = vst.msk [vmem:[%s1227_s11 + $0x4] sm:$0xf] %vm331_vm2, %v355_v17  ;;  %s850_s5 = sshll.u32 %s985_s10, 4  ;;  %s851_s5 = int_to_ptr.vmem [resolvable:$false] %s850_s5 }
 0x1c3   : > { %p848_p0 = pnand %p847_p11, %p1106_p10  ;;  %s852_s12 = scalar_lea.vmem %s851_s5, 512 }
 0x1c4   : > { %p853_p9 = scmp.lt.s32.totalorder %s1236_s25, %s851_s5  ;;  %p854_p1 = scmp.lt.s32.totalorder %s852_s12, %s846_s7 }
 0x1c5   : > { %v375_v18 = vpop.permute.xlu1 %374  ;;  %v370_v19 = vpop.permute.xlu0 %369  ;;  %p849_p5 = pneg %p848_p0 }
 0x1c6   : > { %630 = vst.msk [vmem:[%s1175_s14 + $0xc] sm:$0xf] %vm331_vm2, %v375_v18  ;;  %629 = vst.msk [vmem:[%s1227_s11 + $0x8] sm:$0xf] %vm331_vm2, %v370_v19  ;;  %p855_p2 = por %p854_p1, %p853_p9 }
 0x1c8   : > { %p856_p7 = pnand %p855_p2, %p849_p5 }
 0x1ca   : > { %859 = shalt.err (!%p856_p7)
}
 0x1cb   : > { %s860_s14 = scalar_lea.hbm %s1242_s23, 256  ;;  %s864_s10 = scalar_lea.hbm %s1340_s2, 512 }
 0x1cc   : > { %p861_p3 = scmp.ne.s32.totalorder %s1242_s23, %s860_s14  ;;  %p865_p6 = scmp.lt.u32.totalorder %s1242_s23, %s1340_s2 }
 0x1cd   : > { %p866_p8 = scmp.lt.u32.totalorder %s864_s10, %s860_s14  ;;  %p868_p11 = scmp.lt.u32.totalorder %s860_s14, %s1242_s23 }
 0x1ce   : > { %p862_p4 = pnand %p861_p3, %p1106_p10 }
 0x1cf   : > { %p867_p12 = por %p866_p8, %p865_p6 }
 0x1d0   : > { %p863_p13 = pneg %p862_p4 }
 0x1d1   : > { %p869_p0 = por %p868_p11, %p867_p12 }
 0x1d3   : > { %p870_p5 = pnand %p869_p0, %p863_p13 }
 0x1d5   : > { %873 = shalt.err (!%p870_p5)
}
 0x1d6   : > { %665 = dma.vmem_to_hbm [thread:$0]  (%p1106_p10), %s1236_s25, 256, %s1242_s23, %s390_s27, %s977_s13, %s977_s13, %s984_s21   ;;  %v385_v20 = vpop.permute.xlu0 %384 }
 0x1d7   : > { %s1359_s22 = sshll.u32 %s1227_s11, 4  ;;  %s1284_s12 = scalar_lea.hbm %s1342_s4, %s1183_s30  ;;  %632 = vst.msk [vmem:[%s1227_s11 + $0xc] sm:$0xf] %vm331_vm2, %v385_v20  ;;  %s1278_s22 = int_to_ptr.vmem [resolvable:$true] %s1359_s22 }
 0x1d8   : > { %s874_s28 = scalar_lea.vmem %s1278_s22, 256  ;;  %s986_s25 = smov [#allocation10]  }
 0x1d9   : > { %p875_p9 = scmp.ne.s32.totalorder %s1278_s22, %s874_s28  ;;  %s878_s23 = sshll.u32 %s986_s25, 4  ;;  %s879_s23 = int_to_ptr.vmem [resolvable:$false] %s878_s23 }
 0x1da   : > { %s880_s27 = scalar_lea.vmem %s879_s23, 512  ;;  %p881_p7 = scmp.lt.s32.totalorder %s1278_s22, %s879_s23 }
 0x1db   : > { %p876_p1 = pnand %p875_p9, %p1106_p10  ;;  %p882_p3 = scmp.lt.s32.totalorder %s880_s27, %s874_s28 }
 0x1dd   : > { %p877_p2 = pneg %p876_p1  ;;  %p883_p4 = por %p882_p3, %p881_p7 }
 0x1df   : > { %p884_p13 = pnand %p883_p4, %p877_p2 }
 0x1e1   : > { %887 = shalt.err (!%p884_p13)
}
 0x1e2   : > { %s888_s30 = scalar_lea.hbm %s1284_s12, 256  ;;  %s892_s9 = scalar_lea.hbm %s1342_s4, 512 }
 0x1e3   : > { %p889_p6 = scmp.ne.s32.totalorder %s1284_s12, %s888_s30  ;;  %p893_p11 = scmp.lt.u32.totalorder %s1284_s12, %s1342_s4 }
 0x1e4   : > { %p894_p0 = scmp.lt.u32.totalorder %s892_s9, %s888_s30  ;;  %p896_p9 = scmp.lt.u32.totalorder %s888_s30, %s1284_s12 }
 0x1e5   : > { %p890_p8 = pnand %p889_p6, %p1106_p10 }
 0x1e6   : > { %p895_p5 = por %p894_p0, %p893_p11 }
 0x1e7   : > { %p891_p12 = pneg %p890_p8 }
 0x1e8   : > { %p897_p1 = por %p896_p9, %p895_p5 }
 0x1ea   : > { %p898_p2 = pnand %p897_p1, %p891_p12 }
 0x1ec   : > { %901 = shalt.err (!%p898_p2)
}
 0x1ed   : > { %667 = dma.vmem_to_hbm [thread:$0]  (%p1106_p10), %s1278_s22, 256, %s1284_s12, %s1197_s18, %s977_s13, %s977_s13, %s984_s21  }
 0x1ee PF: > { %s463_s26 = sand.u32 1, %s944_s15   ;;  %p1360_p7 = scmp.ne.s32.totalorder %s1348_s24, 0 }
 0x1ef   : > { %p1361_p3 = scmp.ge.s32.totalorder %s964_s20, 2  ;;  %s464_s7 = scalar_lea.sflag [#allocation4], %s463_s26 }
 0x1f1   : > { %p680_p4 = pnand %p1361_p3, %p1360_p7 }
 0x1f3   : > { %935 = dma.done.wait (!%p680_p4), %s464_s7, 256  }
 0x1f4   : > { %937 = vsyncadd (!%p680_p4), %s464_s7, 4294967040  ;;  %s1362_s6 = sadd.s32 4294967294, %s964_s20  }
 0x1f5   : > { %s472_s28 = sand.u32 1, %s1362_s6  }
 0x1f6   : > { %s473_s25 = scalar_lea.sflag [#allocation9], %s472_s28 }
 0x1f7   : > { %939 = dma.done.wait (!%p680_p4), %s473_s25, 512  }
 0x1f8   : > { %941 = vsyncadd (!%p680_p4), %s473_s25, 4294966784  ;;  %s25_s20 = sadd.s32 1, %s964_s20   ;;  %s1363_s15 = smov %s948_s16 }
 0x1f9   : > { %p22_p10 = scmp.ge.s32.totalorder %s25_s20, 4   ;;  %s1364_s16 = smov %s952_s17 }
 0x1fa   : > { %s1365_s17 = smov %s1115_s8  ;;  %s1366_s18 = smov %s960_s19 }
 0x1fb   : > { %s1367_s19 = smov %s1369_s29  ;;  %24 = sbr.rel (!%p22_p10) target bundleno = 9 (0x9), region = 118 }
 0x202   :  { %487 = vsyncpa [#allocation3], 1 }
 0x203   :  { %489 = vsyncpa [#allocation3 + $0x1], 1 }
 0x204   :  { %490 = vsyncpa [#allocation6], 1 }
 0x205   :  { %491 = vsyncpa [#allocation4], 1 }
 0x206   :  { %493 = vsyncpa [#allocation4 + $0x1], 1 }
 0x207   :  { %494 = vsyncpa [#allocation9], 1 }
 0x208   :  { %496 = vsyncpa [#allocation9 + $0x1], 1 }

</bundles_post_ra>
